<compile_context>
chip_gen: v5e
topology: v5e:2x2
jax: 0.10.0
libtpu: 0.0.40
codegen_flags: <defaults>
</compile_context>

<pallas_src>
import functools

import jax
import jax.numpy as jnp
import numpy as np
from jax.experimental import pallas as pl
from jax.experimental.pallas import tpu as pltpu


def _round_up(x, m):
    return (x + m - 1) // m * m


def _pick_batch_tile(N, T, target_rows):
    """Largest divisor bn of N with bn*T <= target_rows, preferring >= 2 grid steps
    (so v7x's two TensorCores both get tiles under a 'parallel' grid axis)."""
    divisors = [d for d in range(1, N + 1) if N % d == 0]
    fits = [d for d in divisors if d * T <= target_rows] or [1]
    multi = [d for d in fits if N // d >= 2]
    return max(multi) if multi else max(fits)


def _mlp_kernel(drop_ref, cap_ref, yemb_ref, w1_ref, b1_ref, w2_ref, b2_ref,
                o_ref, *, gelu_dtype):
    # drop_ref: (bn,1,1) i32, cap_ref: (bn,T,C) f32, yemb_ref: (T,C) f32 (resident)
    # w1_ref: (C,Hp) cdt, b1_ref: (1,Hp) f32, w2_ref: (Hp,Hp) cdt, b2_ref: (1,Hp) f32
    # o_ref: (bn,T,Hp)
    #
    # token_drop select, fused (classifier-free guidance).
    x = jnp.where(drop_ref[...] == 1, yemb_ref[...][None], cap_ref[...])
    bn, T, C = x.shape
    # Flatten the batch group into one big-M matmul; cast to the MXU input dtype here
    # (in-kernel, so HBM only ever sees the original f32 activations once).
    x2 = x.reshape(bn * T, C).astype(w1_ref.dtype)
    h = jnp.dot(x2, w1_ref[...], preferred_element_type=jnp.float32)
    h = (h + b1_ref[...]).astype(gelu_dtype)
    h = jax.nn.gelu(h, approximate=True)              # matches nn.GELU(approximate='tanh')
    o = jnp.dot(h.astype(w2_ref.dtype), w2_ref[...],
                preferred_element_type=jnp.float32)
    o = o + b2_ref[...]
    o_ref[...] = o.reshape(o_ref.shape).astype(o_ref.dtype)


def caption_embedder(caption, drop_ids, y_embedding, w1, b1, w2, b2, *,
                     compute_dtype=jnp.bfloat16, gelu_dtype=jnp.float32,
                     out_dtype=None, target_rows=1024):
    """caption: (N, T, C); drop_ids: (N,) int; returns (N, T, H).

    compute_dtype: MXU input dtype (bf16 default; float32 escape hatch for exactness).
    gelu_dtype:    bias-add/GELU dtype (f32 default; bf16 recommended on v6e/v7x).
    out_dtype:     output dtype (defaults to caption.dtype; bf16 halves writeback).
    """
    N, T, C = caption.shape
    H = w1.shape[1]
    out_dtype = caption.dtype if out_dtype is None else out_dtype
    cdt = jnp.dtype(compute_dtype)

    bn = _pick_batch_tile(N, T, target_rows)
    grid_n = N // bn

    # Only the small parameters are padded/cast in the wrapper (and only when needed);
    # the (N,T,C) activations are passed through untouched.
    Hp = _round_up(H, 128)
    if Hp != H:
        w1 = jnp.pad(w1, ((0, 0), (0, Hp - H)))
        w2 = jnp.pad(w2, ((0, Hp - H), (0, Hp - H)))
        b1 = jnp.pad(b1, (0, Hp - H))
        b2 = jnp.pad(b2, (0, Hp - H))
    w1 = w1.astype(cdt)
    w2 = w2.astype(cdt)
    b1 = b1.reshape(1, Hp).astype(jnp.float32)
    b2 = b2.reshape(1, Hp).astype(jnp.float32)
    y_emb = y_embedding.astype(caption.dtype)
    drop = drop_ids.astype(jnp.int32).reshape(N, 1, 1)

    cap_isz = jnp.dtype(caption.dtype).itemsize
    out_isz = jnp.dtype(out_dtype).itemsize

    # --- VMEM budget: resident params (single-buffered) + double-buffered caption/out
    # tiles + in-kernel intermediates, with 2x slack.  v7x = 64 MiB physical.
    resident = (C * Hp + Hp * Hp) * cdt.itemsize + 2 * Hp * 4 + T * C * cap_isz
    streamed = 2 * bn * (T * C * cap_isz + T * Hp * out_isz + 4)
    scratch = bn * T * (Hp * 4 + C * cdt.itemsize)
    vmem_limit = int(min(max(2 * (resident + streamed + scratch), 32 << 20), 100 << 20))
    # TODO(synk): for very large H (resident bf16 weights > ~1/3 of v7x's 64 MiB VMEM)
    # switch to a K/N-tiled grid with an f32 accumulator scratch instead of this
    # weights-resident design.

    cost = pl.CostEstimate(
        flops=2 * N * T * (C * Hp + Hp * Hp),
        transcendentals=N * T * Hp,                      # tanh in GELU
        bytes_accessed=(N * T * C * cap_isz
                        + (C * Hp + Hp * Hp) * cdt.itemsize + 2 * Hp * 4
                        + T * C * cap_isz + N * 4
                        + N * T * Hp * out_isz),
    )

    kernel = functools.partial(_mlp_kernel, gelu_dtype=gelu_dtype)

    def run(weight_mode):
        def const_spec(shape):
            zeros = (0,) * len(shape)
            if weight_mode is None:
                return pl.BlockSpec(shape, lambda i: zeros)
            return pl.BlockSpec(shape, lambda i: zeros, pipeline_mode=weight_mode)

        grid_spec = pltpu.PrefetchScalarGridSpec(
            num_scalar_prefetch=0,
            grid=(grid_n,),
            in_specs=[
                pl.BlockSpec((bn, 1, 1), lambda i: (i, 0, 0)),   # drop ids (streamed, tiny)
                pl.BlockSpec((bn, T, C), lambda i: (i, 0, 0)),   # caption tile (streamed)
                const_spec((T, C)),                              # y_embedding (resident)
                const_spec((C, Hp)),                             # fc1 weight  (resident)
                const_spec((1, Hp)),                             # fc1 bias    (resident)
                const_spec((Hp, Hp)),                            # fc2 weight  (resident)
                const_spec((1, Hp)),                             # fc2 bias    (resident)
            ],
            out_specs=pl.BlockSpec((bn, T, Hp), lambda i: (i, 0, 0)),  # lane-dense slab
        )
        return pl.pallas_call(
            kernel,
            out_shape=jax.ShapeDtypeStruct((N, T, Hp), out_dtype),
            grid_spec=grid_spec,
            compiler_params=pltpu.CompilerParams(
                dimension_semantics=("parallel",),       # independent batch tiles
                vmem_limit_bytes=vmem_limit,
            ),
            cost_estimate=cost,
        )(drop, caption, y_emb, w1, b1, w2, b2)

    try:
        out = run(pl.Buffered(1))   # single-buffer the grid-constant operands
    except Exception:
        out = run(None)             # fallback: default double-buffering

    return out if Hp == H else out[..., :H]


def caption_embedder_ref(caption, drop_ids, y_embedding, w1, b1, w2, b2):
    """Pure-JAX f32 reference (mirrors the PyTorch forward with force_drop_ids)."""
    x = jnp.where((drop_ids == 1)[:, None, None], y_embedding[None], caption)
    h = jax.nn.gelu(x @ w1 + b1, approximate=True)
    return h @ w2 + b2


def _make_inputs(key, N, T, C, H):
    k_cap, k_yemb, k_w1, k_b1, k_w2, k_b2, k_drop = jax.random.split(key, 7)
    caption = jax.random.normal(k_cap, (N, T, C), dtype=jnp.float32)
    # y_embedding = randn(token_num, in_channels) / in_channels ** 0.5
    y_embedding = jax.random.normal(k_yemb, (T, C), dtype=jnp.float32) / (C ** 0.5)
    w1 = jax.random.normal(k_w1, (C, H), dtype=jnp.float32) * 0.02
    b1 = jax.random.normal(k_b1, (H,), dtype=jnp.float32) * 0.02
    w2 = jax.random.normal(k_w2, (H, H), dtype=jnp.float32) * 0.02
    b2 = jax.random.normal(k_b2, (H,), dtype=jnp.float32) * 0.02
    drop_ids = (jax.random.uniform(k_drop, (N,)) < 0.5).astype(jnp.int32)
    return caption, drop_ids, y_embedding, w1, b1, w2, b2


if __name__ == "__main__":
    key = jax.random.PRNGKey(0)
    k0, k1 = jax.random.split(key)

    # Case 1: small shapes consistent with the module (token_num=8, C=32, hidden=32),
    # force_drop_ids = [1, 0] so one batch takes the y_embedding path.
    N, T, C, H = 2, 8, 32, 32
    caption, _, y_embedding, w1, b1, w2, b2 = _make_inputs(k0, N, T, C, H)
    drop_ids = jnp.array([1, 0], dtype=jnp.int32)
    ref = caption_embedder_ref(caption, drop_ids, y_embedding, w1, b1, w2, b2)

    # bf16 MXU path (default): loose tolerance vs f32 reference.
    out_bf16 = jax.block_until_ready(
        caption_embedder(caption, drop_ids, y_embedding, w1, b1, w2, b2))
    np.testing.assert_allclose(np.asarray(out_bf16), np.asarray(ref),
                               rtol=5e-2, atol=1e-2)

    # f32 MXU path: tight tolerance.
    out_f32 = jax.block_until_ready(
        caption_embedder(caption, drop_ids, y_embedding, w1, b1, w2, b2,
                         compute_dtype=jnp.float32))
    np.testing.assert_allclose(np.asarray(out_f32), np.asarray(ref),
                               rtol=1e-5, atol=1e-5)

    # Case 2: exercises H padding (H=48 -> 128), non-128 C, and a 3-step grid.
    N2, T2, C2, H2 = 3, 8, 40, 48
    caption2, drop2, yemb2, w1_2, b1_2, w2_2, b2_2 = _make_inputs(k1, N2, T2, C2, H2)
    ref2 = caption_embedder_ref(caption2, drop2, yemb2, w1_2, b1_2, w2_2, b2_2)
    out2 = jax.block_until_ready(
        caption_embedder(caption2, drop2, yemb2, w1_2, b1_2, w2_2, b2_2,
                         compute_dtype=jnp.float32))
    np.testing.assert_allclose(np.asarray(out2), np.asarray(ref2),
                               rtol=1e-5, atol=1e-5)

    # TODO(synk): the stochastic training-time drop (torch.rand < uncond_prob) is replaced
    # by deterministic force_drop_ids; hook pltpu.prng_random_bits if stochastic drop is needed.
    print("KERNEL_OK")
</pallas_src>

<mosaic_0001>
module attributes {stable_mosaic.version = 11 : i64} {
  func.func @_mlp_kernel(%arg0: i32, %arg1: memref<1x1x1xi32, #tpu.memory_space<vmem>>, %arg2: memref<1x8x32xf32, #tpu.memory_space<vmem>>, %arg3: memref<8x32xf32, #tpu.memory_space<vmem>>, %arg4: memref<32x128xbf16, #tpu.memory_space<vmem>>, %arg5: memref<1x128xf32, #tpu.memory_space<vmem>>, %arg6: memref<128x128xbf16, #tpu.memory_space<vmem>>, %arg7: memref<1x128xf32, #tpu.memory_space<vmem>>, %arg8: memref<1x8x128xf32, #tpu.memory_space<vmem>>) attributes {dimension_semantics = [#tpu.dimension_semantics<parallel>], iteration_bounds = array<i64: 2>, scalar_prefetch = 0 : i64, scratch_operands = 0 : i64, tpu.core_type = #tpu.core_type<tc>, window_params = [{transform_indices = @transform_0, window_bounds = array<i64: 1, 1, 1>}, {transform_indices = @transform_1, window_bounds = array<i64: 1, 8, 32>}, {pipeline_mode = #tpu.pipeline_mode<synchronous>, transform_indices = @transform_2, window_bounds = array<i64: 8, 32>}, {pipeline_mode = #tpu.pipeline_mode<synchronous>, transform_indices = @transform_3, window_bounds = array<i64: 32, 128>}, {pipeline_mode = #tpu.pipeline_mode<synchronous>, transform_indices = @transform_4, window_bounds = array<i64: 1, 128>}, {pipeline_mode = #tpu.pipeline_mode<synchronous>, transform_indices = @transform_5, window_bounds = array<i64: 128, 128>}, {pipeline_mode = #tpu.pipeline_mode<synchronous>, transform_indices = @transform_6, window_bounds = array<i64: 1, 128>}, {transform_indices = @transform_7, window_bounds = array<i64: 1, 8, 128>}]} {
    %c0 = arith.constant 0 : index
    %c0_0 = arith.constant 0 : index
    %c0_1 = arith.constant 0 : index
    %0 = vector.load %arg1[%c0, %c0_0, %c0_1] : memref<1x1x1xi32, #tpu.memory_space<vmem>>, vector<1x1x1xi32>
    %c1_i32 = arith.constant 1 : i32
    %1 = vector.broadcast %c1_i32 : i32 to vector<1x1x1xi32>
    %2 = arith.cmpi eq, %0, %1 : vector<1x1x1xi32>
    %c0_2 = arith.constant 0 : index
    %c0_3 = arith.constant 0 : index
    %3 = vector.load %arg3[%c0_2, %c0_3] : memref<8x32xf32, #tpu.memory_space<vmem>>, vector<8x32xf32>
    %4 = vector.shape_cast %3 : vector<8x32xf32> to vector<1x8x32xf32>
    %c0_4 = arith.constant 0 : index
    %c0_5 = arith.constant 0 : index
    %c0_6 = arith.constant 0 : index
    %5 = vector.load %arg2[%c0_4, %c0_5, %c0_6] : memref<1x8x32xf32, #tpu.memory_space<vmem>>, vector<1x8x32xf32>
    %6 = vector.shape_cast %2 : vector<1x1x1xi1> to vector<1x1x1xi1>
    %7 = vector.broadcast %6 : vector<1x1x1xi1> to vector<1x8x32xi1>
    %8 = arith.select %7, %4, %5 : vector<1x8x32xi1>, vector<1x8x32xf32>
    %9 = vector.shape_cast %8 : vector<1x8x32xf32> to vector<8x32xf32>
    %10 = arith.truncf %9 : vector<8x32xf32> to vector<8x32xbf16>
    %c0_7 = arith.constant 0 : index
    %c0_8 = arith.constant 0 : index
    %11 = vector.load %arg4[%c0_7, %c0_8] : memref<32x128xbf16, #tpu.memory_space<vmem>>, vector<32x128xbf16>
    %cst = arith.constant dense<0.000000e+00> : vector<8x128xf32>
    %12 = tpu.matmul %10, %11, %cst {dimension_numbers = #tpu.dot_dimension_numbers<[1], [0], [0], [1], [0, 0, 1, 1], [], []>} : vector<8x32xbf16>, vector<32x128xbf16>, vector<8x128xf32> -> vector<8x128xf32>
    %c0_9 = arith.constant 0 : index
    %c0_10 = arith.constant 0 : index
    %13 = vector.load %arg5[%c0_9, %c0_10] : memref<1x128xf32, #tpu.memory_space<vmem>>, vector<1x128xf32>
    %14 = vector.broadcast %13 : vector<1x128xf32> to vector<8x128xf32>
    %15 = arith.addf %12, %14 : vector<8x128xf32>
    %16 = arith.mulf %15, %15 : vector<8x128xf32>
    %17 = arith.mulf %15, %16 : vector<8x128xf32>
    %cst_11 = arith.constant 4.471500e-02 : f32
    %18 = vector.broadcast %cst_11 : f32 to vector<8x128xf32>
    %19 = arith.mulf %18, %17 : vector<8x128xf32>
    %20 = arith.addf %15, %19 : vector<8x128xf32>
    %cst_12 = arith.constant 0.797884583 : f32
    %21 = vector.broadcast %cst_12 : f32 to vector<8x128xf32>
    %22 = arith.mulf %21, %20 : vector<8x128xf32>
    %23 = math.tanh %22 : vector<8x128xf32>
    %cst_13 = arith.constant 1.000000e+00 : f32
    %24 = vector.broadcast %cst_13 : f32 to vector<8x128xf32>
    %25 = arith.addf %24, %23 : vector<8x128xf32>
    %cst_14 = arith.constant 5.000000e-01 : f32
    %26 = vector.broadcast %cst_14 : f32 to vector<8x128xf32>
    %27 = arith.mulf %26, %25 : vector<8x128xf32>
    %28 = arith.mulf %15, %27 : vector<8x128xf32>
    %29 = arith.truncf %28 : vector<8x128xf32> to vector<8x128xbf16>
    %c0_15 = arith.constant 0 : index
    %c0_16 = arith.constant 0 : index
    %30 = vector.load %arg6[%c0_15, %c0_16] : memref<128x128xbf16, #tpu.memory_space<vmem>>, vector<128x128xbf16>
    %cst_17 = arith.constant dense<0.000000e+00> : vector<8x128xf32>
    %31 = tpu.matmul %29, %30, %cst_17 {dimension_numbers = #tpu.dot_dimension_numbers<[1], [0], [0], [1], [0, 0, 1, 1], [], []>} : vector<8x128xbf16>, vector<128x128xbf16>, vector<8x128xf32> -> vector<8x128xf32>
    %c0_18 = arith.constant 0 : index
    %c0_19 = arith.constant 0 : index
    %32 = vector.load %arg7[%c0_18, %c0_19] : memref<1x128xf32, #tpu.memory_space<vmem>>, vector<1x128xf32>
    %33 = vector.broadcast %32 : vector<1x128xf32> to vector<8x128xf32>
    %34 = arith.addf %31, %33 : vector<8x128xf32>
    %35 = vector.shape_cast %34 : vector<8x128xf32> to vector<1x8x128xf32>
    %c0_20 = arith.constant 0 : index
    %c0_21 = arith.constant 0 : index
    %c0_22 = arith.constant 0 : index
    %36 = vector.load %arg8[%c0_20, %c0_21, %c0_22] : memref<1x8x128xf32, #tpu.memory_space<vmem>>, vector<1x8x128xf32>
    tpu.vector_store %arg8[%c0_20, %c0_21, %c0_22], %35 {strides = array<i32>} : memref<1x8x128xf32, #tpu.memory_space<vmem>>, vector<1x8x128xf32>,
    return
  }
  func.func @transform_0(%arg0: i32) -> (i32, i32, i32) {
    %c0_i32 = arith.constant 0 : i32
    %c0_i32_0 = arith.constant 0 : i32
    %c0_i32_1 = arith.constant 0 : i32
    return %arg0, %c0_i32, %c0_i32_0 : i32, i32, i32
  }
  func.func @transform_1(%arg0: i32) -> (i32, i32, i32) {
    %c0_i32 = arith.constant 0 : i32
    %c0_i32_0 = arith.constant 0 : i32
    %c0_i32_1 = arith.constant 0 : i32
    return %arg0, %c0_i32, %c0_i32_0 : i32, i32, i32
  }
  func.func @transform_2(%arg0: i32) -> (i32, i32) {
    %c0_i32 = arith.constant 0 : i32
    %c0_i32_0 = arith.constant 0 : i32
    %c0_i32_1 = arith.constant 0 : i32
    return %c0_i32, %c0_i32_0 : i32, i32
  }
  func.func @transform_3(%arg0: i32) -> (i32, i32) {
    %c0_i32 = arith.constant 0 : i32
    %c0_i32_0 = arith.constant 0 : i32
    %c0_i32_1 = arith.constant 0 : i32
    return %c0_i32, %c0_i32_0 : i32, i32
  }
  func.func @transform_4(%arg0: i32) -> (i32, i32) {
    %c0_i32 = arith.constant 0 : i32
    %c0_i32_0 = arith.constant 0 : i32
    %c0_i32_1 = arith.constant 0 : i32
    return %c0_i32, %c0_i32_0 : i32, i32
  }
  func.func @transform_5(%arg0: i32) -> (i32, i32) {
    %c0_i32 = arith.constant 0 : i32
    %c0_i32_0 = arith.constant 0 : i32
    %c0_i32_1 = arith.constant 0 : i32
    return %c0_i32, %c0_i32_0 : i32, i32
  }
  func.func @transform_6(%arg0: i32) -> (i32, i32) {
    %c0_i32 = arith.constant 0 : i32
    %c0_i32_0 = arith.constant 0 : i32
    %c0_i32_1 = arith.constant 0 : i32
    return %c0_i32, %c0_i32_0 : i32, i32
  }
  func.func @transform_7(%arg0: i32) -> (i32, i32, i32) {
    %c0_i32 = arith.constant 0 : i32
    %c0_i32_0 = arith.constant 0 : i32
    %c0_i32_1 = arith.constant 0 : i32
    return %arg0, %c0_i32, %c0_i32_0 : i32, i32, i32
  }
}

module attributes {stable_mosaic.version = 11 : i64} {
  func.func @_mlp_kernel(%arg0: i32, %arg1: memref<1x1x1xi32, #tpu.memory_space<vmem>>, %arg2: memref<1x8x32xf32, #tpu.memory_space<vmem>>, %arg3: memref<8x32xf32, #tpu.memory_space<vmem>>, %arg4: memref<32x128xbf16, #tpu.memory_space<vmem>>, %arg5: memref<1x128xf32, #tpu.memory_space<vmem>>, %arg6: memref<128x128xbf16, #tpu.memory_space<vmem>>, %arg7: memref<1x128xf32, #tpu.memory_space<vmem>>, %arg8: memref<1x8x128xf32, #tpu.memory_space<vmem>>) attributes {dimension_semantics = [#tpu.dimension_semantics<parallel>], iteration_bounds = array<i64: 2>, scalar_prefetch = 0 : i64, scratch_operands = 0 : i64, tpu.core_type = #tpu.core_type<tc>, window_params = [{transform_indices = @transform_0, window_bounds = array<i64: 1, 1, 1>}, {transform_indices = @transform_1, window_bounds = array<i64: 1, 8, 32>}, {pipeline_mode = #tpu.pipeline_mode<synchronous>, transform_indices = @transform_2, window_bounds = array<i64: 8, 32>}, {pipeline_mode = #tpu.pipeline_mode<synchronous>, transform_indices = @transform_3, window_bounds = array<i64: 32, 128>}, {pipeline_mode = #tpu.pipeline_mode<synchronous>, transform_indices = @transform_4, window_bounds = array<i64: 1, 128>}, {pipeline_mode = #tpu.pipeline_mode<synchronous>, transform_indices = @transform_5, window_bounds = array<i64: 128, 128>}, {pipeline_mode = #tpu.pipeline_mode<synchronous>, transform_indices = @transform_6, window_bounds = array<i64: 1, 128>}, {transform_indices = @transform_7, window_bounds = array<i64: 1, 8, 128>}]} {
    %c0 = arith.constant 0 : index
    %c0_0 = arith.constant 0 : index
    %c0_1 = arith.constant 0 : index
    %0 = vector.load %arg1[%c0, %c0_0, %c0_1] : memref<1x1x1xi32, #tpu.memory_space<vmem>>, vector<1x1x1xi32>
    %c1_i32 = arith.constant 1 : i32
    %1 = vector.broadcast %c1_i32 : i32 to vector<1x1x1xi32>
    %2 = arith.cmpi eq, %0, %1 : vector<1x1x1xi32>
    %c0_2 = arith.constant 0 : index
    %c0_3 = arith.constant 0 : index
    %3 = vector.load %arg3[%c0_2, %c0_3] : memref<8x32xf32, #tpu.memory_space<vmem>>, vector<8x32xf32>
    %4 = vector.shape_cast %3 : vector<8x32xf32> to vector<1x8x32xf32>
    %c0_4 = arith.constant 0 : index
    %c0_5 = arith.constant 0 : index
    %c0_6 = arith.constant 0 : index
    %5 = vector.load %arg2[%c0_4, %c0_5, %c0_6] : memref<1x8x32xf32, #tpu.memory_space<vmem>>, vector<1x8x32xf32>
    %6 = vector.shape_cast %2 : vector<1x1x1xi1> to vector<1x1x1xi1>
    %7 = vector.broadcast %6 : vector<1x1x1xi1> to vector<1x8x32xi1>
    %8 = arith.select %7, %4, %5 : vector<1x8x32xi1>, vector<1x8x32xf32>
    %9 = vector.shape_cast %8 : vector<1x8x32xf32> to vector<8x32xf32>
    %10 = arith.truncf %9 : vector<8x32xf32> to vector<8x32xbf16>
    %c0_7 = arith.constant 0 : index
    %c0_8 = arith.constant 0 : index
    %11 = vector.load %arg4[%c0_7, %c0_8] : memref<32x128xbf16, #tpu.memory_space<vmem>>, vector<32x128xbf16>
    %cst = arith.constant dense<0.000000e+00> : vector<8x128xf32>
    %12 = tpu.matmul %10, %11, %cst {dimension_numbers = #tpu.dot_dimension_numbers<[1], [0], [0], [1], [0, 0, 1, 1], [], []>} : vector<8x32xbf16>, vector<32x128xbf16>, vector<8x128xf32> -> vector<8x128xf32>
    %c0_9 = arith.constant 0 : index
    %c0_10 = arith.constant 0 : index
    %13 = vector.load %arg5[%c0_9, %c0_10] : memref<1x128xf32, #tpu.memory_space<vmem>>, vector<1x128xf32>
    %14 = vector.broadcast %13 : vector<1x128xf32> to vector<8x128xf32>
    %15 = arith.addf %12, %14 : vector<8x128xf32>
    %16 = arith.mulf %15, %15 : vector<8x128xf32>
    %17 = arith.mulf %15, %16 : vector<8x128xf32>
    %cst_11 = arith.constant 4.471500e-02 : f32
    %18 = vector.broadcast %cst_11 : f32 to vector<8x128xf32>
    %19 = arith.mulf %18, %17 : vector<8x128xf32>
    %20 = arith.addf %15, %19 : vector<8x128xf32>
    %cst_12 = arith.constant 0.797884583 : f32
    %21 = vector.broadcast %cst_12 : f32 to vector<8x128xf32>
    %22 = arith.mulf %21, %20 : vector<8x128xf32>
    %23 = math.tanh %22 : vector<8x128xf32>
    %cst_13 = arith.constant 1.000000e+00 : f32
    %24 = vector.broadcast %cst_13 : f32 to vector<8x128xf32>
    %25 = arith.addf %24, %23 : vector<8x128xf32>
    %cst_14 = arith.constant 5.000000e-01 : f32
    %26 = vector.broadcast %cst_14 : f32 to vector<8x128xf32>
    %27 = arith.mulf %26, %25 : vector<8x128xf32>
    %28 = arith.mulf %15, %27 : vector<8x128xf32>
    %29 = arith.truncf %28 : vector<8x128xf32> to vector<8x128xbf16>
    %c0_15 = arith.constant 0 : index
    %c0_16 = arith.constant 0 : index
    %30 = vector.load %arg6[%c0_15, %c0_16] : memref<128x128xbf16, #tpu.memory_space<vmem>>, vector<128x128xbf16>
    %cst_17 = arith.constant dense<0.000000e+00> : vector<8x128xf32>
    %31 = tpu.matmul %29, %30, %cst_17 {dimension_numbers = #tpu.dot_dimension_numbers<[1], [0], [0], [1], [0, 0, 1, 1], [], []>} : vector<8x128xbf16>, vector<128x128xbf16>, vector<8x128xf32> -> vector<8x128xf32>
    %c0_18 = arith.constant 0 : index
    %c0_19 = arith.constant 0 : index
    %32 = vector.load %arg7[%c0_18, %c0_19] : memref<1x128xf32, #tpu.memory_space<vmem>>, vector<1x128xf32>
    %33 = vector.broadcast %32 : vector<1x128xf32> to vector<8x128xf32>
    %34 = arith.addf %31, %33 : vector<8x128xf32>
    %35 = vector.shape_cast %34 : vector<8x128xf32> to vector<1x8x128xf32>
    %c0_20 = arith.constant 0 : index
    %c0_21 = arith.constant 0 : index
    %c0_22 = arith.constant 0 : index
    %36 = vector.load %arg8[%c0_20, %c0_21, %c0_22] : memref<1x8x128xf32, #tpu.memory_space<vmem>>, vector<1x8x128xf32>
    tpu.vector_store %arg8[%c0_20, %c0_21, %c0_22], %35 {strides = array<i32>} : memref<1x8x128xf32, #tpu.memory_space<vmem>>, vector<1x8x128xf32>,
    return
  }
  func.func @transform_0(%arg0: i32) -> (i32, i32, i32) {
    %c0_i32 = arith.constant 0 : i32
    %c0_i32_0 = arith.constant 0 : i32
    %c0_i32_1 = arith.constant 0 : i32
    return %arg0, %c0_i32, %c0_i32_0 : i32, i32, i32
  }
  func.func @transform_1(%arg0: i32) -> (i32, i32, i32) {
    %c0_i32 = arith.constant 0 : i32
    %c0_i32_0 = arith.constant 0 : i32
    %c0_i32_1 = arith.constant 0 : i32
    return %arg0, %c0_i32, %c0_i32_0 : i32, i32, i32
  }
  func.func @transform_2(%arg0: i32) -> (i32, i32) {
    %c0_i32 = arith.constant 0 : i32
    %c0_i32_0 = arith.constant 0 : i32
    %c0_i32_1 = arith.constant 0 : i32
    return %c0_i32, %c0_i32_0 : i32, i32
  }
  func.func @transform_3(%arg0: i32) -> (i32, i32) {
    %c0_i32 = arith.constant 0 : i32
    %c0_i32_0 = arith.constant 0 : i32
    %c0_i32_1 = arith.constant 0 : i32
    return %c0_i32, %c0_i32_0 : i32, i32
  }
  func.func @transform_4(%arg0: i32) -> (i32, i32) {
    %c0_i32 = arith.constant 0 : i32
    %c0_i32_0 = arith.constant 0 : i32
    %c0_i32_1 = arith.constant 0 : i32
    return %c0_i32, %c0_i32_0 : i32, i32
  }
  func.func @transform_5(%arg0: i32) -> (i32, i32) {
    %c0_i32 = arith.constant 0 : i32
    %c0_i32_0 = arith.constant 0 : i32
    %c0_i32_1 = arith.constant 0 : i32
    return %c0_i32, %c0_i32_0 : i32, i32
  }
  func.func @transform_6(%arg0: i32) -> (i32, i32) {
    %c0_i32 = arith.constant 0 : i32
    %c0_i32_0 = arith.constant 0 : i32
    %c0_i32_1 = arith.constant 0 : i32
    return %c0_i32, %c0_i32_0 : i32, i32
  }
  func.func @transform_7(%arg0: i32) -> (i32, i32, i32) {
    %c0_i32 = arith.constant 0 : i32
    %c0_i32_0 = arith.constant 0 : i32
    %c0_i32_1 = arith.constant 0 : i32
    return %arg0, %c0_i32, %c0_i32_0 : i32, i32, i32
  }
}

</mosaic_0001>

<bundles_post_ra>
// kernel: tpu_custom_call.1
= control target key start
LH: loop header
LB: loop body
LE: loop exit
PB: predicated region body
PF: predicated region fallthrough
CT: control target
= control target key end

     0   :  { %s1193_s0 = inlined_call_operand.vmem [shape: s32[2,1,1], index: 0, kind: input, shape index: {}]   ;;  %s1194_s1 = inlined_call_operand.hbm [shape: f32[2,8,32], index: 1, kind: input, shape index: {}]   ;;  %s1195_s2 = inlined_call_operand.hbm [shape: f32[8,32], index: 2, kind: input, shape index: {}]   ;;  %s1196_s3 = inlined_call_operand.hbm [shape: bf16[32,128], index: 3, kind: input, shape index: {}]   ;;  %s1197_s4 = inlined_call_operand.vmem [shape: f32[1,128], index: 4, kind: input, shape index: {}]   ;;  %s1198_s5 = inlined_call_operand.hbm [shape: bf16[128,128], index: 5, kind: input, shape index: {}]   ;;  %s1199_s6 = inlined_call_operand.vmem [shape: f32[1,128], index: 6, kind: input, shape index: {}]   ;;  %s1200_s7 = inlined_call_operand.hbm [shape: f32[2,8,128], index: 7, kind: output, shape index: {}]  }
   0x1   :  { %1201 = sst [smem:[#allocation15_spill]] %s1195_s2 }
   0x2   :  { %12 = vsyncpa [#allocation3], 0 }
   0x3   :  { %14 = vsyncpa [#allocation3 + $0x1], 0 }
   0x4   :  { %15 = vsyncpa [#allocation6], 0 }
   0x5   :  { %16 = vsyncpa [#allocation9], 0 }
   0x6   :  { %17 = vsyncpa [#allocation4], 0 }
   0x7   :  { %19 = vsyncpa [#allocation4 + $0x1], 0  ;;  %s1020_s24 = smov 0   ;;  %s1022_s25 = smov 0  }
   0x8   :  { %s1024_s26 = smov 0   ;;  %s1026_s27 = smov 0  }
   0x9 LB: > { %s1041_s28 = sadd.s32 4294967295, %s972_s27   ;;  %s624_s29 = sadd.s32 4294967294, %s972_s27   ;;  %s972_s27 = sphi %s1026_s27, %s1213_s27   ;;  %s968_s26 = sphi %s1024_s26, %s1212_s26   ;;  %s964_s25 = sphi %s1022_s25, %s1211_s25   ;;  %s960_s24 = sphi %s1020_s24, %s1210_s24  }
   0xa   : > { %p71_p0 = scmp.ne.s32.totalorder %s964_s25, %s960_s24  ;;  %p72_p1 = scmp.eq.s32.totalorder %s1041_s28, 0 }
   0xb   : > { %p200_p2 = scmp.eq.s32.totalorder %s1041_s28, 1  ;;  %p206_p3 = scmp.eq.s32.totalorder %s624_s29, 1 }
   0xc   : > { %p1050_p4 = por %p72_p1, %p71_p0  ;;  %p625_p5 = scmp.ge.s32.totalorder %s972_s27, 1 }
   0xd   : > { %p1055_p6 = por %p206_p3, %p71_p0  ;;  %p213_p7 = scmp.lt.s32.totalorder %s972_s27, 3 }
   0xe   : > { %s1204_s2 = sld [smem:[#allocation15_spill]]  ;;  %s974_s13 = smov [#allocation5]  }
   0xf   : > { %p1063_p8 = pnand %p625_p5, %p213_p7  ;;  %s227_s14 = sshll.u32 %s974_s13, 4  ;;  %s228_s14 = int_to_ptr.vmem [resolvable:$true] %s227_s14 }
  0x10   : > { %s236_s17 = sshll.u32 %s1196_s3, 4  ;;  %s975_s19 = smov [#allocation7]   ;;  %s237_s17 = int_to_ptr.hbm [resolvable:$true] %s236_s17 }
  0x11   : > { %p709_p10 = pneg %p1063_p8  ;;  %s238_s20 = sshll.u32 %s975_s19, 4  ;;  %s239_s20 = int_to_ptr.vmem [resolvable:$true] %s238_s20 }
  0x12   : > { %s976_s21 = smov 64   ;;  %s977_s22 = smov 4  }
  0x13   : > { %p1075_p11 = pnand %p709_p10, %p72_p1  ;;  %s253_s9 = sshll.u32 %s1198_s5, 4  ;;  %s254_s9 = int_to_ptr.hbm [resolvable:$true] %s253_s9 }
  0x14   : > { %s225_s11 = sshll.u32 %s1204_s2, 4  ;;  %s978_s10 = smov [#allocation8]   ;;  %s226_s11 = int_to_ptr.hbm [resolvable:$true] %s225_s11 }
  0x15   : > { %712 = dma.hbm_to_vmem [thread:$0]  (!%p1075_p11), %s226_s11, 128, %s228_s14, [#allocation6]  }
  0x16   : > { %715 = dma.hbm_to_vmem [thread:$0]  (!%p1075_p11), %s237_s17, 256, %s239_s20, [#allocation6], %s976_s21, %s976_s21, %s977_s22  }
  0x17   : > { %s255_s13 = sshll.u32 %s978_s10, 4  ;;  %s1089_s11 = sadd.s32 1, %s972_s27   ;;  %s256_s13 = int_to_ptr.vmem [resolvable:$true] %s255_s13 }
  0x18   : > { %718 = dma.hbm_to_vmem [thread:$0]  (!%p1075_p11), %s254_s9, 1024, %s256_s13, [#allocation9], %s976_s21, %s976_s21, %s977_s22  }
  0x19   : > { %s55_s14 = ssub.s32 %s972_s27, %s1089_s11  ;;  %s58_s15 = sadd.s32 1, %s968_s26 }
  0x1a   : > { %p56_p12 = scmp.eq.s32.totalorder %s55_s14, 0  ;;  %p65_p13 = scmp.ne.s32.totalorder %s968_s26, %s964_s25 }
  0x1b   : > { %p66_p0 = scmp.eq.s32.totalorder %s972_s27, 0  ;;  %p730_p5 = scmp.lt.s32.totalorder %s972_s27, 2 }
  0x1c   : > { %s1098_s16 = scalar_select %p56_p12, %s968_s26, %s58_s15  }
  0x1d   : > { %p1102_p3 = por %p200_p2, %p65_p13  ;;  %s278_s19 = sand.u32 1, %s968_s26  }
  0x1e   : > { %s631_s20 = sshll.u32 %s972_s27, 3  ;;  %p67_p7 = por %p66_p0, %p65_p13 }
  0x1f   : > { %s630_s18 = sshll.u32 %s278_s19, 3  ;;  %s286_s23 = scalar_lea.hbm %s1194_s1, %s631_s20 }
  0x20   : > { %s288_s29 = sshll.u32 %s286_s23, 4  ;;  %s282_s9 = scalar_lea.vmem [#allocation2], %s630_s18  ;;  %s289_s29 = int_to_ptr.hbm [resolvable:$true] %s288_s29 }
  0x21   : > { %s290_s10 = sshll.u32 %s282_s9, 4  ;;  %p1112_p10 = pnand %p730_p5, %p67_p7  ;;  %s291_s10 = int_to_ptr.vmem [resolvable:$true] %s290_s10 }
  0x22   : > { %s279_s14 = scalar_lea.sflag [#allocation3], %s278_s19  ;;  %s868_s15 = sshra.s32 %s289_s29, 4  ;;  %s869_s15 = int_to_ptr.hbm [resolvable:$true] %s868_s15 }
  0x23   : > { %s870_s2 = scalar_lea.hbm %s869_s15, 8  ;;  %p872_p11 = pneg %p1112_p10 }
  0x24   : > { %p871_p2 = scmp.ne.s32.totalorder %s869_s15, %s870_s2  ;;  %s875_s18 = scalar_lea.hbm %s1194_s1, 16 }
  0x25   : > { %p876_p0 = scmp.lt.s32.totalorder %s869_s15, %s1194_s1  ;;  %p877_p5 = scmp.lt.s32.totalorder %s875_s18, %s870_s2 }
  0x26   : > { %p873_p12 = pnand %p872_p11, %p871_p2 }
  0x27   : > { %p878_p7 = por %p877_p5, %p876_p0 }
  0x28   : > { %p874_p13 = pneg %p873_p12 }
  0x2a   : > { %p879_p9 = pnand %p878_p7, %p874_p13 }
  0x2c   : > { %882 = shalt.err (!%p879_p9)
}
  0x2d   : > { %722 = dma.hbm_to_vmem [thread:$0]  (!%p1112_p10), %s289_s29, 128, %s291_s10, %s279_s14  }
  0x2e   : > { %299 = sbr.rel (%p1063_p8) target bundleno = 472 (0x1d8), region = 48  ;;  %s1129_s19 = sand.u32 (!%p1063_p8), 1, %s964_s25  }
  0x2f   : > { %s633_s9 = sshll.u32 (!%p1063_p8), %s1129_s19, 3  ;;  %s302_s20 = scalar_lea.sflag (!%p1063_p8), [#allocation3], %s1129_s19 }
  0x30   : > { %s305_s2 = scalar_lea.vmem (!%p1063_p8), [#allocation2], %s633_s9 }
  0x33   : > { %943 = dma.done.wait (%p1050_p4), %s302_s20, 128  }
  0x34   : > { %945 = vsyncadd (%p1050_p4), %s302_s20, 4294967168 }
  0x35   : > { %947 = dma.done.wait (%p72_p1), [#allocation6], 384  }
  0x36   : > { %949 = vsyncadd (%p72_p1), [#allocation6], 4294966912 }
  0x37   : > { %951 = dma.done.wait (%p72_p1), [#allocation9], 1024  }
  0x38   : > { %953 = vsyncadd (%p72_p1), [#allocation9], 4294966272  ;;  %p355_p8 = scmp.lt.s32.totalorder %s1041_s28, 1  ;;  %v979_v0 = vmov 0   ;;  %v684_v2 = vld [vmem:[#allocation7 + $0x8] sm:$0xff]  ;;  %v683_v5 = vld [vmem:[#allocation7] sm:$0xff] }
  0x39   : > { %773 = vset.pattern.permute.xlu0 %v979_v0  ;;  %401 = vmatpush.bf16.msra.mxu0 %v684_v2  ;;  %v692_v6 = vld [vmem:[#allocation8 + $0x38] sm:$0xff]  ;;  %v361_v7 = vld [vmem:[#allocation5] sm:$0xff]  ;;  %vm391_vm2 = vcmask 261120   ;;  %v691_v12 = vld [vmem:[#allocation8 + $0x30] sm:$0xff]  ;;  %s680_s15 = sshll.u32 %s1041_s28, 3  ;;  %s501_s29 = scalar_lea.sflag [#allocation4], %s1129_s19 }
  0x3a   : > { %s356_s12 = scalar_select %p355_p8, %s1041_s28, 1  ;;  %486 = vmatpush.bf16.msra.mxu1 %v692_v6  ;;  %v362_v8 = vld [vmem:[%s305_s2] sm:$0xff]  ;;  %v690_v13 = vld [vmem:[#allocation8 + $0x28] sm:$0xff]  ;;  %v687_v16 = vld [vmem:[#allocation8 + $0x10] sm:$0xff] }
  0x3b   : > { %v689_v14 = vld [vmem:[#allocation8 + $0x20] sm:$0xff]  ;;  %v688_v15 = vld [vmem:[#allocation8 + $0x18] sm:$0xff]  ;;  %v686_v17 = vld [vmem:[#allocation8 + $0x8] sm:$0xff]  ;;  %s511_s22 = scalar_lea.hbm %s1200_s7, %s680_s15  ;;  %s354_s2 = scalar_lea.vmem [#allocation10], %s633_s9 }
  0x3c   : > { %s357_s10 = scalar_lea.vmem %s1193_s0, %s356_s12  ;;  %v685_v18 = vld [vmem:[#allocation8] sm:$0xff]  ;;  %v774_v19 = vld [vmem:[%s1197_s4] ss:$0 sm:$0xff]  ;;  %s513_s12 = sshll.u32 %s354_s2, 4  ;;  %s514_s12 = int_to_ptr.vmem [resolvable:$true] %s513_s12 }
  0x3d   : > { %v359_v1 = vld [vmem:[%s357_s10] sm:$0x1]  ;;  %402 = vmatpush.bf16.msra.mxu0 %v683_v5  ;;  %s515_s30 = sshll.u32 %s511_s22, 4  ;;  %s918_s15 = scalar_lea.hbm %s1200_s7, 16  ;;  %s516_s30 = int_to_ptr.hbm [resolvable:$true] %s515_s30 }
  0x3e   : > { %vm360_vm0 = vcmp.eq.s32.totalorder %v359_v1, 1  ;;  %487 = vmatpush.bf16.msra.mxu1 %v691_v12  ;;  %v775_v33 = vld [vmem:[%s1199_s6] ss:$0 sm:$0xff]  ;;  %s912_s28 = sshra.s32 %s516_s30, 4  ;;  %s913_s28 = int_to_ptr.hbm [resolvable:$true] %s912_s28 }
  0x3f   : > { %v363_v3 = vsel %vm360_vm0, 1, %v979_v0  ;;  %s914_s10 = scalar_lea.hbm %s913_s28, 8  ;;  %p919_p10 = scmp.lt.s32.totalorder %s913_s28, %s1200_s7 }
  0x40   : > { %v364_v4 = vperm.slane %v363_v3, 0  ;;  %p915_p1 = scmp.ne.s32.totalorder %s913_s28, %s914_s10  ;;  %p920_p2 = scmp.lt.s32.totalorder %s918_s15, %s914_s10 }
  0x42   : > { %366 = vperm.xlu0 %773, %v364_v4   ;;  %488 = vmatpush.bf16.msra.mxu1 %v690_v13  ;;  %p916_p4 = pnand %p915_p1, %p1102_p3  ;;  %p921_p11 = por %p920_p2, %p919_p10 }
  0x44   : > { %p917_p9 = pneg %p916_p4 }
  0x46   : > { %489 = vmatpush.bf16.msra.mxu1 %v689_v14  ;;  %p922_p12 = pnand %p921_p11, %p917_p9 }
  0x4a   : > { %490 = vmatpush.bf16.msra.mxu1 %v688_v15 }
  0x4e   : > { %491 = vmatpush.bf16.msra.mxu1 %v687_v16 }
  0x52   : > { %492 = vmatpush.bf16.msra.mxu1 %v686_v17 }
  0x56   : > { %493 = vmatpush.bf16.msra.mxu1 %v685_v18 }
  0xb4   : > { %v367_v9 = vpop.permute.xlu0 %366 }
  0xb5   : > { %vm368_vm1 = vcmp.eq.s32.totalorder %v367_v9, 1 }
  0xb6   : > { %v369_v10 = vsel %vm368_vm1, %v361_v7, %v362_v8 }
  0xb7   : > { %v370_v11 = vpack.c.bf16 %v369_v10, %v369_v10 }
  0xb9   : > { %646 = vmatmul.msk.bf16.vlgmr.msra.gmra.mxu0 %vm391_vm2, %v370_v11 }
 0x136   : > { %v404_v20 = vpop.f32.mrf.mxu0 }
 0x137   : > { %v405_v21 = vadd.f32 %v774_v19, %v404_v20 }
 0x139   : > { %v408_v22 = vmul.f32 %v405_v21, %v405_v21 }
 0x13b   : > { %v409_v23 = vmul.f32 %v408_v22, %v405_v21 }
 0x13d   : > { %v410_v24 = vmul.f32 0.044715, %v409_v23 }
 0x13e   : > { %v406_v25 = vpop.f32.mrf.mxu0 }
 0x13f   : > { %v411_v26 = vadd.f32 %v410_v24, %v405_v21 }
 0x141   : > { %v412_v27 = vmul.f32 0.7978846, %v411_v26 }
 0x143   : > { %776 = vtanh.f32 %v412_v27 }
 0x149   : > { %v777_v28 = vpop.eup %776 }
 0x14a   : > { %v414_v29 = vadd.f32 1.0, %v777_v28 }
 0x14c   : > { %v415_v30 = vmul.f32 0.5, %v414_v29 }
 0x14e   : > { %v416_v31 = vmul.f32 %v415_v30, %v405_v21 }
 0x150   : > { %v417_v32 = vpack.c.bf16 %v416_v31, %v416_v31 }
 0x152   : > { %494 = vmatmul.bf16.vlgmr.msra.gmra.mxu1 %v417_v32 }
 0x1cf   : > { %v495_v34 = vpop.f32.mrf.mxu1 }
 0x1d0   : > { %v496_v35 = vadd.f32 %v775_v33, %v495_v34 }
 0x1d2   : > { %499 = vst [vmem:[%s354_s2] sm:$0xff] %v496_v35 }
 0x1d3   : > { %925 = shalt.err (!%p922_p12)
}
 0x1d4   : > { %707 = dma.vmem_to_hbm [thread:$0]  (%p1102_p3), %s514_s12, 128, %s516_s30, %s501_s29  }
 0x1d7   : > { %v497_v36 = vpop.f32.mrf.mxu1 }
 0x1d8 PF: > { %s527_s19 = sand.u32 1, %s960_s24   ;;  %p1209_p13 = scmp.ge.s32.totalorder %s972_s27, 2 }
 0x1d9   : > { %s528_s18 = scalar_lea.sflag [#allocation4], %s527_s19 }
 0x1da   : > { %p724_p0 = pnand %p1209_p13, %p1055_p6 }
 0x1dc   : > { %p725_p5 = pneg %p724_p0 }
 0x1de   : > { %955 = dma.done.wait (%p725_p5), %s528_s18, 128  }
 0x1df   : > { %957 = vsyncadd (%p725_p5), %s528_s18, 4294967168  ;;  %p22_p7 = scmp.ge.s32.totalorder %s1089_s11, 4   ;;  %s1210_s24 = smov %s964_s25 }
 0x1e0   : > { %s1211_s25 = smov %s968_s26  ;;  %s1212_s26 = smov %s1098_s16 }
 0x1e1   : > { %s1213_s27 = smov %s1089_s11  ;;  %24 = sbr.rel (!%p22_p7) target bundleno = 9 (0x9), region = 108 }
 0x1e6   :  { %534 = vsyncpa [#allocation3], 1 }
 0x1e7   :  { %536 = vsyncpa [#allocation3 + $0x1], 1 }
 0x1e8   :  { %537 = vsyncpa [#allocation6], 1 }
 0x1e9   :  { %538 = vsyncpa [#allocation9], 1 }
 0x1ea   :  { %539 = vsyncpa [#allocation4], 1 }
 0x1eb   :  { %541 = vsyncpa [#allocation4 + $0x1], 1 }

// kernel: tpu_custom_call.1
= control target key start
LH: loop header
LB: loop body
LE: loop exit
PB: predicated region body
PF: predicated region fallthrough
CT: control target
= control target key end

     0   :  { %s1193_s0 = inlined_call_operand.vmem [shape: s32[2,1,1], index: 0, kind: input, shape index: {}]   ;;  %s1194_s1 = inlined_call_operand.hbm [shape: f32[2,8,32], index: 1, kind: input, shape index: {}]   ;;  %s1195_s2 = inlined_call_operand.hbm [shape: f32[8,32], index: 2, kind: input, shape index: {}]   ;;  %s1196_s3 = inlined_call_operand.hbm [shape: bf16[32,128], index: 3, kind: input, shape index: {}]   ;;  %s1197_s4 = inlined_call_operand.vmem [shape: f32[1,128], index: 4, kind: input, shape index: {}]   ;;  %s1198_s5 = inlined_call_operand.hbm [shape: bf16[128,128], index: 5, kind: input, shape index: {}]   ;;  %s1199_s6 = inlined_call_operand.vmem [shape: f32[1,128], index: 6, kind: input, shape index: {}]   ;;  %s1200_s7 = inlined_call_operand.hbm [shape: f32[2,8,128], index: 7, kind: output, shape index: {}]  }
   0x1   :  { %1201 = sst [smem:[#allocation15_spill]] %s1195_s2 }
   0x2   :  { %12 = vsyncpa [#allocation3], 0 }
   0x3   :  { %14 = vsyncpa [#allocation3 + $0x1], 0 }
   0x4   :  { %15 = vsyncpa [#allocation6], 0 }
   0x5   :  { %16 = vsyncpa [#allocation9], 0 }
   0x6   :  { %17 = vsyncpa [#allocation4], 0 }
   0x7   :  { %19 = vsyncpa [#allocation4 + $0x1], 0  ;;  %s1020_s24 = smov 0   ;;  %s1022_s25 = smov 0  }
   0x8   :  { %s1024_s26 = smov 0   ;;  %s1026_s27 = smov 0  }
   0x9 LB: > { %s1041_s28 = sadd.s32 4294967295, %s972_s27   ;;  %s624_s29 = sadd.s32 4294967294, %s972_s27   ;;  %s972_s27 = sphi %s1026_s27, %s1213_s27   ;;  %s968_s26 = sphi %s1024_s26, %s1212_s26   ;;  %s964_s25 = sphi %s1022_s25, %s1211_s25   ;;  %s960_s24 = sphi %s1020_s24, %s1210_s24  }
   0xa   : > { %p71_p0 = scmp.ne.s32.totalorder %s964_s25, %s960_s24  ;;  %p72_p1 = scmp.eq.s32.totalorder %s1041_s28, 0 }
   0xb   : > { %p200_p2 = scmp.eq.s32.totalorder %s1041_s28, 1  ;;  %p206_p3 = scmp.eq.s32.totalorder %s624_s29, 1 }
   0xc   : > { %p1050_p4 = por %p72_p1, %p71_p0  ;;  %p625_p5 = scmp.ge.s32.totalorder %s972_s27, 1 }
   0xd   : > { %p1055_p6 = por %p206_p3, %p71_p0  ;;  %p213_p7 = scmp.lt.s32.totalorder %s972_s27, 3 }
   0xe   : > { %s1204_s2 = sld [smem:[#allocation15_spill]]  ;;  %s974_s13 = smov [#allocation5]  }
   0xf   : > { %p1063_p8 = pnand %p625_p5, %p213_p7  ;;  %s227_s14 = sshll.u32 %s974_s13, 4  ;;  %s228_s14 = int_to_ptr.vmem [resolvable:$true] %s227_s14 }
  0x10   : > { %s236_s17 = sshll.u32 %s1196_s3, 4  ;;  %s975_s19 = smov [#allocation7]   ;;  %s237_s17 = int_to_ptr.hbm [resolvable:$true] %s236_s17 }
  0x11   : > { %p709_p10 = pneg %p1063_p8  ;;  %s238_s20 = sshll.u32 %s975_s19, 4  ;;  %s239_s20 = int_to_ptr.vmem [resolvable:$true] %s238_s20 }
  0x12   : > { %s976_s21 = smov 64   ;;  %s977_s22 = smov 4  }
  0x13   : > { %p1075_p11 = pnand %p709_p10, %p72_p1  ;;  %s253_s9 = sshll.u32 %s1198_s5, 4  ;;  %s254_s9 = int_to_ptr.hbm [resolvable:$true] %s253_s9 }
  0x14   : > { %s225_s11 = sshll.u32 %s1204_s2, 4  ;;  %s978_s10 = smov [#allocation8]   ;;  %s226_s11 = int_to_ptr.hbm [resolvable:$true] %s225_s11 }
  0x15   : > { %712 = dma.hbm_to_vmem [thread:$0]  (!%p1075_p11), %s226_s11, 128, %s228_s14, [#allocation6]  }
  0x16   : > { %715 = dma.hbm_to_vmem [thread:$0]  (!%p1075_p11), %s237_s17, 256, %s239_s20, [#allocation6], %s976_s21, %s976_s21, %s977_s22  }
  0x17   : > { %s255_s13 = sshll.u32 %s978_s10, 4  ;;  %s1089_s11 = sadd.s32 1, %s972_s27   ;;  %s256_s13 = int_to_ptr.vmem [resolvable:$true] %s255_s13 }
  0x18   : > { %718 = dma.hbm_to_vmem [thread:$0]  (!%p1075_p11), %s254_s9, 1024, %s256_s13, [#allocation9], %s976_s21, %s976_s21, %s977_s22  }
  0x19   : > { %s55_s14 = ssub.s32 %s972_s27, %s1089_s11  ;;  %s58_s15 = sadd.s32 1, %s968_s26 }
  0x1a   : > { %p56_p12 = scmp.eq.s32.totalorder %s55_s14, 0  ;;  %p65_p13 = scmp.ne.s32.totalorder %s968_s26, %s964_s25 }
  0x1b   : > { %p66_p0 = scmp.eq.s32.totalorder %s972_s27, 0  ;;  %p730_p5 = scmp.lt.s32.totalorder %s972_s27, 2 }
  0x1c   : > { %s1098_s16 = scalar_select %p56_p12, %s968_s26, %s58_s15  }
  0x1d   : > { %p1102_p3 = por %p200_p2, %p65_p13  ;;  %s278_s19 = sand.u32 1, %s968_s26  }
  0x1e   : > { %s631_s20 = sshll.u32 %s972_s27, 3  ;;  %p67_p7 = por %p66_p0, %p65_p13 }
  0x1f   : > { %s630_s18 = sshll.u32 %s278_s19, 3  ;;  %s286_s23 = scalar_lea.hbm %s1194_s1, %s631_s20 }
  0x20   : > { %s288_s29 = sshll.u32 %s286_s23, 4  ;;  %s282_s9 = scalar_lea.vmem [#allocation2], %s630_s18  ;;  %s289_s29 = int_to_ptr.hbm [resolvable:$true] %s288_s29 }
  0x21   : > { %s290_s10 = sshll.u32 %s282_s9, 4  ;;  %p1112_p10 = pnand %p730_p5, %p67_p7  ;;  %s291_s10 = int_to_ptr.vmem [resolvable:$true] %s290_s10 }
  0x22   : > { %s279_s14 = scalar_lea.sflag [#allocation3], %s278_s19  ;;  %s868_s15 = sshra.s32 %s289_s29, 4  ;;  %s869_s15 = int_to_ptr.hbm [resolvable:$true] %s868_s15 }
  0x23   : > { %s870_s2 = scalar_lea.hbm %s869_s15, 8  ;;  %p872_p11 = pneg %p1112_p10 }
  0x24   : > { %p871_p2 = scmp.ne.s32.totalorder %s869_s15, %s870_s2  ;;  %s875_s18 = scalar_lea.hbm %s1194_s1, 16 }
  0x25   : > { %p876_p0 = scmp.lt.s32.totalorder %s869_s15, %s1194_s1  ;;  %p877_p5 = scmp.lt.s32.totalorder %s875_s18, %s870_s2 }
  0x26   : > { %p873_p12 = pnand %p872_p11, %p871_p2 }
  0x27   : > { %p878_p7 = por %p877_p5, %p876_p0 }
  0x28   : > { %p874_p13 = pneg %p873_p12 }
  0x2a   : > { %p879_p9 = pnand %p878_p7, %p874_p13 }
  0x2c   : > { %882 = shalt.err (!%p879_p9)
}
  0x2d   : > { %722 = dma.hbm_to_vmem [thread:$0]  (!%p1112_p10), %s289_s29, 128, %s291_s10, %s279_s14  }
  0x2e   : > { %299 = sbr.rel (%p1063_p8) target bundleno = 472 (0x1d8), region = 48  ;;  %s1129_s19 = sand.u32 (!%p1063_p8), 1, %s964_s25  }
  0x2f   : > { %s633_s9 = sshll.u32 (!%p1063_p8), %s1129_s19, 3  ;;  %s302_s20 = scalar_lea.sflag (!%p1063_p8), [#allocation3], %s1129_s19 }
  0x30   : > { %s305_s2 = scalar_lea.vmem (!%p1063_p8), [#allocation2], %s633_s9 }
  0x33   : > { %943 = dma.done.wait (%p1050_p4), %s302_s20, 128  }
  0x34   : > { %945 = vsyncadd (%p1050_p4), %s302_s20, 4294967168 }
  0x35   : > { %947 = dma.done.wait (%p72_p1), [#allocation6], 384  }
  0x36   : > { %949 = vsyncadd (%p72_p1), [#allocation6], 4294966912 }
  0x37   : > { %951 = dma.done.wait (%p72_p1), [#allocation9], 1024  }
  0x38   : > { %953 = vsyncadd (%p72_p1), [#allocation9], 4294966272  ;;  %p355_p8 = scmp.lt.s32.totalorder %s1041_s28, 1  ;;  %v979_v0 = vmov 0   ;;  %v684_v2 = vld [vmem:[#allocation7 + $0x8] sm:$0xff]  ;;  %v683_v5 = vld [vmem:[#allocation7] sm:$0xff] }
  0x39   : > { %773 = vset.pattern.permute.xlu0 %v979_v0  ;;  %401 = vmatpush.bf16.msra.mxu0 %v684_v2  ;;  %v692_v6 = vld [vmem:[#allocation8 + $0x38] sm:$0xff]  ;;  %v361_v7 = vld [vmem:[#allocation5] sm:$0xff]  ;;  %vm391_vm2 = vcmask 261120   ;;  %v691_v12 = vld [vmem:[#allocation8 + $0x30] sm:$0xff]  ;;  %s680_s15 = sshll.u32 %s1041_s28, 3  ;;  %s501_s29 = scalar_lea.sflag [#allocation4], %s1129_s19 }
  0x3a   : > { %s356_s12 = scalar_select %p355_p8, %s1041_s28, 1  ;;  %486 = vmatpush.bf16.msra.mxu1 %v692_v6  ;;  %v362_v8 = vld [vmem:[%s305_s2] sm:$0xff]  ;;  %v690_v13 = vld [vmem:[#allocation8 + $0x28] sm:$0xff]  ;;  %v687_v16 = vld [vmem:[#allocation8 + $0x10] sm:$0xff] }
  0x3b   : > { %v689_v14 = vld [vmem:[#allocation8 + $0x20] sm:$0xff]  ;;  %v688_v15 = vld [vmem:[#allocation8 + $0x18] sm:$0xff]  ;;  %v686_v17 = vld [vmem:[#allocation8 + $0x8] sm:$0xff]  ;;  %s511_s22 = scalar_lea.hbm %s1200_s7, %s680_s15  ;;  %s354_s2 = scalar_lea.vmem [#allocation10], %s633_s9 }
  0x3c   : > { %s357_s10 = scalar_lea.vmem %s1193_s0, %s356_s12  ;;  %v685_v18 = vld [vmem:[#allocation8] sm:$0xff]  ;;  %v774_v19 = vld [vmem:[%s1197_s4] ss:$0 sm:$0xff]  ;;  %s513_s12 = sshll.u32 %s354_s2, 4  ;;  %s514_s12 = int_to_ptr.vmem [resolvable:$true] %s513_s12 }
  0x3d   : > { %v359_v1 = vld [vmem:[%s357_s10] sm:$0x1]  ;;  %402 = vmatpush.bf16.msra.mxu0 %v683_v5  ;;  %s515_s30 = sshll.u32 %s511_s22, 4  ;;  %s918_s15 = scalar_lea.hbm %s1200_s7, 16  ;;  %s516_s30 = int_to_ptr.hbm [resolvable:$true] %s515_s30 }
  0x3e   : > { %vm360_vm0 = vcmp.eq.s32.totalorder %v359_v1, 1  ;;  %487 = vmatpush.bf16.msra.mxu1 %v691_v12  ;;  %v775_v33 = vld [vmem:[%s1199_s6] ss:$0 sm:$0xff]  ;;  %s912_s28 = sshra.s32 %s516_s30, 4  ;;  %s913_s28 = int_to_ptr.hbm [resolvable:$true] %s912_s28 }
  0x3f   : > { %v363_v3 = vsel %vm360_vm0, 1, %v979_v0  ;;  %s914_s10 = scalar_lea.hbm %s913_s28, 8  ;;  %p919_p10 = scmp.lt.s32.totalorder %s913_s28, %s1200_s7 }
  0x40   : > { %v364_v4 = vperm.slane %v363_v3, 0  ;;  %p915_p1 = scmp.ne.s32.totalorder %s913_s28, %s914_s10  ;;  %p920_p2 = scmp.lt.s32.totalorder %s918_s15, %s914_s10 }
  0x42   : > { %366 = vperm.xlu0 %773, %v364_v4   ;;  %488 = vmatpush.bf16.msra.mxu1 %v690_v13  ;;  %p916_p4 = pnand %p915_p1, %p1102_p3  ;;  %p921_p11 = por %p920_p2, %p919_p10 }
  0x44   : > { %p917_p9 = pneg %p916_p4 }
  0x46   : > { %489 = vmatpush.bf16.msra.mxu1 %v689_v14  ;;  %p922_p12 = pnand %p921_p11, %p917_p9 }
  0x4a   : > { %490 = vmatpush.bf16.msra.mxu1 %v688_v15 }
  0x4e   : > { %491 = vmatpush.bf16.msra.mxu1 %v687_v16 }
  0x52   : > { %492 = vmatpush.bf16.msra.mxu1 %v686_v17 }
  0x56   : > { %493 = vmatpush.bf16.msra.mxu1 %v685_v18 }
  0xb4   : > { %v367_v9 = vpop.permute.xlu0 %366 }
  0xb5   : > { %vm368_vm1 = vcmp.eq.s32.totalorder %v367_v9, 1 }
  0xb6   : > { %v369_v10 = vsel %vm368_vm1, %v361_v7, %v362_v8 }
  0xb7   : > { %v370_v11 = vpack.c.bf16 %v369_v10, %v369_v10 }
  0xb9   : > { %646 = vmatmul.msk.bf16.vlgmr.msra.gmra.mxu0 %vm391_vm2, %v370_v11 }
 0x136   : > { %v404_v20 = vpop.f32.mrf.mxu0 }
 0x137   : > { %v405_v21 = vadd.f32 %v774_v19, %v404_v20 }
 0x139   : > { %v408_v22 = vmul.f32 %v405_v21, %v405_v21 }
 0x13b   : > { %v409_v23 = vmul.f32 %v408_v22, %v405_v21 }
 0x13d   : > { %v410_v24 = vmul.f32 0.044715, %v409_v23 }
 0x13e   : > { %v406_v25 = vpop.f32.mrf.mxu0 }
 0x13f   : > { %v411_v26 = vadd.f32 %v410_v24, %v405_v21 }
 0x141   : > { %v412_v27 = vmul.f32 0.7978846, %v411_v26 }
 0x143   : > { %776 = vtanh.f32 %v412_v27 }
 0x149   : > { %v777_v28 = vpop.eup %776 }
 0x14a   : > { %v414_v29 = vadd.f32 1.0, %v777_v28 }
 0x14c   : > { %v415_v30 = vmul.f32 0.5, %v414_v29 }
 0x14e   : > { %v416_v31 = vmul.f32 %v415_v30, %v405_v21 }
 0x150   : > { %v417_v32 = vpack.c.bf16 %v416_v31, %v416_v31 }
 0x152   : > { %494 = vmatmul.bf16.vlgmr.msra.gmra.mxu1 %v417_v32 }
 0x1cf   : > { %v495_v34 = vpop.f32.mrf.mxu1 }
 0x1d0   : > { %v496_v35 = vadd.f32 %v775_v33, %v495_v34 }
 0x1d2   : > { %499 = vst [vmem:[%s354_s2] sm:$0xff] %v496_v35 }
 0x1d3   : > { %925 = shalt.err (!%p922_p12)
}
 0x1d4   : > { %707 = dma.vmem_to_hbm [thread:$0]  (%p1102_p3), %s514_s12, 128, %s516_s30, %s501_s29  }
 0x1d7   : > { %v497_v36 = vpop.f32.mrf.mxu1 }
 0x1d8 PF: > { %s527_s19 = sand.u32 1, %s960_s24   ;;  %p1209_p13 = scmp.ge.s32.totalorder %s972_s27, 2 }
 0x1d9   : > { %s528_s18 = scalar_lea.sflag [#allocation4], %s527_s19 }
 0x1da   : > { %p724_p0 = pnand %p1209_p13, %p1055_p6 }
 0x1dc   : > { %p725_p5 = pneg %p724_p0 }
 0x1de   : > { %955 = dma.done.wait (%p725_p5), %s528_s18, 128  }
 0x1df   : > { %957 = vsyncadd (%p725_p5), %s528_s18, 4294967168  ;;  %p22_p7 = scmp.ge.s32.totalorder %s1089_s11, 4   ;;  %s1210_s24 = smov %s964_s25 }
 0x1e0   : > { %s1211_s25 = smov %s968_s26  ;;  %s1212_s26 = smov %s1098_s16 }
 0x1e1   : > { %s1213_s27 = smov %s1089_s11  ;;  %24 = sbr.rel (!%p22_p7) target bundleno = 9 (0x9), region = 108 }
 0x1e6   :  { %534 = vsyncpa [#allocation3], 1 }
 0x1e7   :  { %536 = vsyncpa [#allocation3 + $0x1], 1 }
 0x1e8   :  { %537 = vsyncpa [#allocation6], 1 }
 0x1e9   :  { %538 = vsyncpa [#allocation9], 1 }
 0x1ea   :  { %539 = vsyncpa [#allocation4], 1 }
 0x1eb   :  { %541 = vsyncpa [#allocation4 + $0x1], 1 }

</bundles_post_ra>
